<compile_context>
chip_gen: v5e
topology: v5e:2x2
jax: 0.10.0
libtpu: 0.0.40
codegen_flags: <defaults>
</compile_context>

<pallas_src>
import functools

import jax
import jax.numpy as jnp
from jax.experimental import pallas as pl
from jax.experimental.pallas import tpu as pltpu


# ---------------------------------------------------------------------------
# Kernels
# ---------------------------------------------------------------------------

def _silu_store(o_ref, row_slice, acc, bias, bf16_act):
    """acc(+bias) -> SiLU -> single store into o_ref[0, row_slice, :]."""
    z = acc + bias                                   # BN shift in f32
    if bf16_act:
        z = z.astype(jnp.bfloat16)                   # bf16 VPU/EUP path (v6e/v7x)
    o_ref[0, row_slice, :] = (z * jax.nn.sigmoid(z)).astype(o_ref.dtype)


def _conv_small_kernel(a_ref, w_ref, b_ref, o_ref, *, bf16_act):
    """Small-C3 path (3*C1 < 128): one K = 9*C1 matmul per tile.

    a_ref: (1, TP, 9*C1) bf16   9-tap operand (built in glue)
    w_ref: (9*C1, TC2)   bf16   folded conv+BN weight tile
    b_ref: (1, TC2)      f32    folded BN shift tile
    o_ref: (1, TP, TC2)  bf16   output tile
    """
    acc = jnp.dot(a_ref[0], w_ref[...], preferred_element_type=jnp.float32)
    _silu_store(o_ref, slice(None), acc, b_ref[...], bf16_act)


def _conv_big_kernel(ae_ref, aeh_ref, ao_ref, w_ref, b_ref, o_ref, *,
                     TH, Wo, bf16_act):
    """Large-C3 path: three per-kh matmuls; kh=2 halo is a single output row.

    ae_ref:  (1, TP, C3)  bf16  even padded-row taps for this tile (kh=0, kh=2)
    aeh_ref: (1, Wo, C3)  bf16  first even row of the NEXT tile (kh=2 halo)
    ao_ref:  (1, TP, C3)  bf16  odd padded-row taps (kh=1)
    w_ref:   (3, C3, TC2) bf16  per-kh folded weights
    b_ref:   (1, TC2)     f32   folded BN shift
    o_ref:   (1, TP, TC2) bf16  output tile
    """
    bias = b_ref[...]
    split = (TH - 1) * Wo                            # static

    if TH > 1:
        # rows [0, split): kh=2 taps come from this tile, shifted down one row.
        acc = (
            jnp.dot(ae_ref[0, pl.ds(0, split), :], w_ref[0],
                    preferred_element_type=jnp.float32)
            + jnp.dot(ao_ref[0, pl.ds(0, split), :], w_ref[1],
                      preferred_element_type=jnp.float32)
            + jnp.dot(ae_ref[0, pl.ds(Wo, split), :], w_ref[2],
                      preferred_element_type=jnp.float32))
        _silu_store(o_ref, pl.ds(0, split), acc, bias, bf16_act)

    # last output row of the tile: kh=2 taps come from the 1-row halo.
    acc = (
        jnp.dot(ae_ref[0, pl.ds(split, Wo), :], w_ref[0],
                preferred_element_type=jnp.float32)
        + jnp.dot(ao_ref[0, pl.ds(split, Wo), :], w_ref[1],
                  preferred_element_type=jnp.float32)
        + jnp.dot(aeh_ref[0], w_ref[2], preferred_element_type=jnp.float32))
    _silu_store(o_ref, pl.ds(split, Wo), acc, bias, bf16_act)


# ---------------------------------------------------------------------------
# Generation-aware configuration helpers
# ---------------------------------------------------------------------------

def _vmem_capacity_bytes():
    try:
        return int(pltpu.get_tpu_info().vmem_capacity_bytes)
    except Exception:
        return 64 * 1024 * 1024                      # conservative (v7x per-core)


def _bf16_epilogue_default():
    """bf16 SiLU epilogue on chips with bf16 VPU/EUP (v6e/v7x); f32 otherwise."""
    try:
        kind = jax.devices()[0].device_kind.lower()
    except Exception:
        return False
    return not any(v in kind for v in ("v2", "v3", "v4", "v5"))


def _choose_c2_tile(C2p):
    """Output-channel tile (multiple of 128, <= 512) -> third grid axis for deep layers."""
    if C2p <= 512:
        return C2p
    for t in (512, 256, 128):
        if C2p % t == 0:
            return t
    return C2p


def _choose_tile_rows(Ho, Wo, per_pixel_bytes, fixed_bytes, vmem_budget,
                      max_pixels=4096):
    """Largest TH | Ho whose tile fits the VMEM budget; prefer >= 2 row tiles and
    16-row (bf16 sublane) aligned tiles."""
    valid = []
    for t in range(1, Ho + 1):
        if Ho % t:
            continue
        tp = t * Wo
        if tp > max_pixels:
            continue
        if t > 1 and fixed_bytes + tp * per_pixel_bytes > vmem_budget:
            continue
        valid.append(t)
    if not valid:
        return 1

    def pick(cands):
        aligned = [t for t in cands if (t * Wo) % 16 == 0]
        return max(aligned) if aligned else max(cands)

    multi = [t for t in valid if Ho // t >= 2]
    return pick(multi) if multi else pick(valid)


_SINGLE_BUFFER_OK = None


def _probe_single_buffering():
    """Probe once (eagerly, outside jit) whether pipeline_mode=pl.Buffered(1) lowers."""
    global _SINGLE_BUFFER_OK
    if _SINGLE_BUFFER_OK is not None:
        return _SINGLE_BUFFER_OK

    def _copy(x_ref, o_ref):
        o_ref[...] = x_ref[...]

    try:
        spec = pl.BlockSpec((8, 128), lambda i: (0, 0),
                            pipeline_mode=pl.Buffered(1))
        fn = pl.pallas_call(
            _copy,
            out_shape=jax.ShapeDtypeStruct((8, 128), jnp.float32),
            grid=(2,),
            in_specs=[spec],
            out_specs=pl.BlockSpec((8, 128), lambda i: (0, 0)))
        jax.block_until_ready(fn(jnp.zeros((8, 128), jnp.float32)))
        _SINGLE_BUFFER_OK = True
    except Exception:
        _SINGLE_BUFFER_OK = False
    return _SINGLE_BUFFER_OK


def _resident_spec(block_shape, index_map):
    """Spec for operands whose block never changes across the grid.

    Single-buffered (pl.Buffered(1)) when supported -- saves one weight copy of
    VMEM (matters for deep layers on v7x's 64 MiB); default double buffering
    otherwise.
    """
    if _SINGLE_BUFFER_OK:
        try:
            return pl.BlockSpec(block_shape, index_map,
                                pipeline_mode=pl.Buffered(1))
        except Exception:
            pass
    return pl.BlockSpec(block_shape, index_map)


# ---------------------------------------------------------------------------
# Forward wrapper
# ---------------------------------------------------------------------------

def conv_forward(x_nchw, params, *, eps=1e-5, channels_last=False):
    """Ultralytics Conv forward: SiLU(BN(Conv2d(x, k=3, s=2, p=1, bias=False))).

    Inference-mode BN folding.  Output is bf16; NCHW by default (module
    semantics), NHWC with channels_last=True (skips the final transpose pass).
    """
    B, C1, H, W = x_nchw.shape
    w = params["w_conv"]                                       # (C2, C1, 3, 3)
    C2 = w.shape[0]
    assert w.shape[1:] == (C1, 3, 3)
    assert H % 4 == 0 and W % 16 == 0, "TODO(synk): ragged H/W not supported"

    Ho, Wo = H // 2, W // 2
    P = Ho * Wo
    C3 = 3 * C1
    C2p = ((C2 + 127) // 128) * 128                            # lane-dense output
    TC2 = _choose_c2_tile(C2p)
    nC = C2p // TC2
    bf16_act = _bf16_epilogue_default()

    cap = _vmem_capacity_bytes()
    budget = int(cap * 0.6)                                    # headroom for Mosaic scratch

    # ---- glue (bf16 throughout): NCHW -> NHWC, pad, fold the 3 width-taps into
    #      the channel axis.  ~1.5x the input, in bf16. ----
    xh = jnp.transpose(x_nchw, (0, 2, 3, 1)).astype(jnp.bfloat16)
    xp = jnp.pad(xh, ((0, 0), (1, 1), (1, 1), (0, 0)))
    cols = [xp[:, :, kw:kw + W - 1:2, :] for kw in range(3)]
    aw = jnp.stack(cols, axis=3).reshape(B, H + 2, Wo, C3)     # (B, Hp, Wo, 3*C1)

    # ---- fold BN (inference) into the conv weight + a bias row ----
    scale = params["bn_gamma"] * jax.lax.rsqrt(params["bn_var"] + eps)   # (C2,)
    shift = params["bn_beta"] - params["bn_mean"] * scale                # (C2,)
    wt = jnp.transpose(w, (2, 3, 1, 0)) * scale                          # (kh, kw, C1, C2)
    wt = jnp.pad(wt, ((0, 0), (0, 0), (0, 0), (0, C2p - C2)))
    bias = jnp.pad(shift, (0, C2p - C2)).reshape(1, C2p).astype(jnp.float32)

    out_shape = jax.ShapeDtypeStruct((B, P, C2p), jnp.bfloat16)
    wb_spec = _resident_spec if nC == 1 else pl.BlockSpec

    if C3 < 128:
        # ----- stem / early layers: one K = 9*C1 matmul per tile -----
        KA = 3 * C3
        w9 = wt.reshape(KA, C2p).astype(jnp.bfloat16)
        taps = jnp.concatenate([aw[:, kh:kh + H:2] for kh in range(3)], axis=-1)
        a9 = taps.reshape(B, P, KA)                            # (B, P, 9*C1) bf16

        per_px = 4 * KA + 8 * TC2                 # in (x2 bufs) + out (x2) + f32 acc
        fixed = 2 * (KA * TC2 * 2 + TC2 * 4)      # weights + bias
        TH = _choose_tile_rows(Ho, Wo, per_px, fixed, budget)
        TP, nT = TH * Wo, Ho // TH
        need = fixed + TP * per_px

        in_specs = [
            pl.BlockSpec((1, TP, KA), lambda b, t, c: (b, t, 0)),
            wb_spec((KA, TC2), lambda b, t, c: (0, c)),
            wb_spec((1, TC2), lambda b, t, c: (0, c)),
        ]
        operands = (a9, w9, bias)
        kern = functools.partial(_conv_small_kernel, bf16_act=bf16_act)
    else:
        # ----- deeper layers: even/odd padded-row split, 3 per-kh matmuls,
        #       one-output-row halo for kh=2 -----
        w3 = wt.reshape(3, C3, C2p).astype(jnp.bfloat16)
        a_e = aw[:, 0::2][:, :Ho + 1].reshape(B, (Ho + 1) * Wo, C3)  # even rows (+ halo row)
        a_o = aw[:, 1::2][:, :Ho].reshape(B, P, C3)                  # odd rows

        per_px = 8 * C3 + 8 * TC2                 # a_e/a_o (x2 bufs) + out (x2) + f32 acc
        fixed = (2 * Wo * C3 * 2                  # 1-row halo (x2 bufs)
                 + 2 * (3 * C3 * TC2 * 2 + TC2 * 4))
        TH = _choose_tile_rows(Ho, Wo, per_px, fixed, budget)
        TP, nT = TH * Wo, Ho // TH
        need = fixed + TP * per_px

        in_specs = [
            pl.BlockSpec((1, TP, C3), lambda b, t, c: (b, t, 0)),             # even rows
            pl.BlockSpec((1, Wo, C3), lambda b, t, c: (b, (t + 1) * TH, 0)),  # 1-row halo
            pl.BlockSpec((1, TP, C3), lambda b, t, c: (b, t, 0)),             # odd rows
            wb_spec((3, C3, TC2), lambda b, t, c: (0, 0, c)),                 # weights
            wb_spec((1, TC2), lambda b, t, c: (0, c)),                        # BN shift
        ]
        operands = (a_e, a_e, a_o, w3, bias)
        kern = functools.partial(_conv_big_kernel, TH=TH, Wo=Wo, bf16_act=bf16_act)

    vmem_limit = int(min(cap * 0.85, max(2 * need, 32 * 1024 * 1024)))

    out = pl.pallas_call(
        kern,
        out_shape=out_shape,
        grid_spec=pltpu.PrefetchScalarGridSpec(
            num_scalar_prefetch=0,
            grid=(B, nT, nC),
            in_specs=in_specs,
            out_specs=pl.BlockSpec((1, TP, TC2), lambda b, t, c: (b, t, c)),
        ),
        compiler_params=pltpu.CompilerParams(
            dimension_semantics=("parallel", "parallel", "parallel"),
            vmem_limit_bytes=vmem_limit,
        ),
    )(*operands)

    out = out[:, :, :C2].reshape(B, Ho, Wo, C2)
    if channels_last:
        return out                                 # NHWC: no extra transpose pass
    return jnp.transpose(out, (0, 3, 1, 2))        # NCHW (PyTorch module layout)


# ---------------------------------------------------------------------------
# Test harness
# ---------------------------------------------------------------------------

def make_params(c1, c2, key=0):
    keys = jax.random.split(jax.random.PRNGKey(key), 5)
    w_scale = 0.3 / (9 * c1) ** 0.5
    return {
        "w_conv": jax.random.normal(keys[0], (c2, c1, 3, 3), jnp.float32) * w_scale,
        "bn_gamma": jax.random.uniform(keys[1], (c2,), jnp.float32, 0.5, 1.5),
        "bn_beta": jax.random.normal(keys[2], (c2,), jnp.float32) * 0.1,
        "bn_mean": jax.random.normal(keys[3], (c2,), jnp.float32) * 0.1,
        "bn_var": jax.random.uniform(keys[4], (c2,), jnp.float32, 0.5, 1.5),
    }


def _reference(x, params, eps=1e-5):
    """Plain XLA conv reference with identically bf16-quantized operands."""
    scale = params["bn_gamma"] / jnp.sqrt(params["bn_var"] + eps)
    shift = params["bn_beta"] - params["bn_mean"] * scale
    wq = (params["w_conv"] * scale[:, None, None, None]
          ).astype(jnp.bfloat16).astype(jnp.float32)
    xq = x.astype(jnp.bfloat16).astype(jnp.float32)
    z = jax.lax.conv_general_dilated(
        xq, wq, (2, 2), ((1, 1), (1, 1)),
        dimension_numbers=("NCHW", "OIHW", "NCHW"))
    z = z + shift[None, :, None, None]
    return z * jax.nn.sigmoid(z)


if __name__ == "__main__":
    _probe_single_buffering()     # eager probe, before any jit tracing

    configs = [
        # (B, C1, H, W, C2): stem-like layer -> small-C3 fused-K path
        (2, 4, 16, 16, 32),
        # deeper layer -> big-C3 path (even/odd split + 1-row halo), nC = 1
        (1, 48, 32, 32, 192),
        # deep layer with output-channel grid axis (C2p = 1024 -> 2 x 512 tiles)
        (1, 48, 16, 16, 1024),
    ]
    for (B, C1, H, W, C2) in configs:
        x = jax.random.normal(jax.random.PRNGKey(0), (B, C1, H, W), jnp.float32)
        params = make_params(C1, C2)

        fwd = jax.jit(functools.partial(conv_forward, params=params))
        out = fwd(x)
        jax.block_until_ready(out)
        assert out.shape == (B, C2, H // 2, W // 2), out.shape
        assert bool(jnp.all(jnp.isfinite(out)))

        ref = _reference(x, params)
        err = float(jnp.max(jnp.abs(out.astype(jnp.float32) - ref)))
        assert err < 5e-2, f"config {(B, C1, H, W, C2)}: max abs err {err}"

    print("KERNEL_OK")
</pallas_src>

<mosaic_0001>
module attributes {stable_mosaic.version = 11 : i64} {
  func.func @_copy(%arg0: i32, %arg1: memref<8x128xf32, #tpu.memory_space<vmem>>, %arg2: memref<8x128xf32, #tpu.memory_space<vmem>>) attributes {dimension_semantics = [#tpu.dimension_semantics<arbitrary>], iteration_bounds = array<i64: 2>, scalar_prefetch = 0 : i64, scratch_operands = 0 : i64, tpu.core_type = #tpu.core_type<tc>, window_params = [{pipeline_mode = #tpu.pipeline_mode<synchronous>, transform_indices = @transform_0, window_bounds = array<i64: 8, 128>}, {pipeline_mode = #tpu.pipeline_mode<synchronous>, transform_indices = @transform_1, window_bounds = array<i64: 8, 128>}]} {
    %c0 = arith.constant 0 : index
    %c0_0 = arith.constant 0 : index
    %0 = vector.load %arg1[%c0, %c0_0] : memref<8x128xf32, #tpu.memory_space<vmem>>, vector<8x128xf32>
    %c0_1 = arith.constant 0 : index
    %c0_2 = arith.constant 0 : index
    %1 = vector.load %arg2[%c0_1, %c0_2] : memref<8x128xf32, #tpu.memory_space<vmem>>, vector<8x128xf32>
    tpu.vector_store %arg2[%c0_1, %c0_2], %0 {strides = array<i32>} : memref<8x128xf32, #tpu.memory_space<vmem>>, vector<8x128xf32>,
    return
  }
  func.func @transform_0(%arg0: i32) -> (i32, i32) {
    %c0_i32 = arith.constant 0 : i32
    %c0_i32_0 = arith.constant 0 : i32
    %c0_i32_1 = arith.constant 0 : i32
    return %c0_i32, %c0_i32_0 : i32, i32
  }
  func.func @transform_1(%arg0: i32) -> (i32, i32) {
    %c0_i32 = arith.constant 0 : i32
    %c0_i32_0 = arith.constant 0 : i32
    %c0_i32_1 = arith.constant 0 : i32
    return %c0_i32, %c0_i32_0 : i32, i32
  }
}

module attributes {stable_mosaic.version = 11 : i64} {
  func.func @_conv_small_kernel(%arg0: i32, %arg1: i32, %arg2: i32, %arg3: memref<1x32x36xbf16, #tpu.memory_space<vmem>>, %arg4: memref<36x128xbf16, #tpu.memory_space<vmem>>, %arg5: memref<1x128xf32, #tpu.memory_space<vmem>>, %arg6: memref<1x32x128xbf16, #tpu.memory_space<vmem>>) attributes {dimension_semantics = [#tpu.dimension_semantics<parallel>, #tpu.dimension_semantics<parallel>, #tpu.dimension_semantics<parallel>], iteration_bounds = array<i64: 2, 2, 1>, scalar_prefetch = 0 : i64, scratch_operands = 0 : i64, tpu.core_type = #tpu.core_type<tc>, window_params = [{transform_indices = @transform_0, window_bounds = array<i64: 1, 32, 36>}, {transform_indices = @transform_1, window_bounds = array<i64: 36, 128>}, {transform_indices = @transform_2, window_bounds = array<i64: 1, 128>}, {transform_indices = @transform_3, window_bounds = array<i64: 1, 32, 128>}]} {
    %c0 = arith.constant 0 : index
    %c0_0 = arith.constant 0 : index
    %c0_1 = arith.constant 0 : index
    %0 = vector.load %arg3[%c0, %c0_0, %c0_1] : memref<1x32x36xbf16, #tpu.memory_space<vmem>>, vector<1x32x36xbf16>
    %1 = vector.shape_cast %0 : vector<1x32x36xbf16> to vector<32x36xbf16>
    %c0_2 = arith.constant 0 : index
    %c0_3 = arith.constant 0 : index
    %2 = vector.load %arg4[%c0_2, %c0_3] : memref<36x128xbf16, #tpu.memory_space<vmem>>, vector<36x128xbf16>
    %cst = arith.constant dense<0.000000e+00> : vector<32x128xf32>
    %3 = tpu.matmul %1, %2, %cst {dimension_numbers = #tpu.dot_dimension_numbers<[1], [0], [0], [1], [0, 0, 1, 1], [], []>} : vector<32x36xbf16>, vector<36x128xbf16>, vector<32x128xf32> -> vector<32x128xf32>
    %c0_4 = arith.constant 0 : index
    %c0_5 = arith.constant 0 : index
    %4 = vector.load %arg5[%c0_4, %c0_5] : memref<1x128xf32, #tpu.memory_space<vmem>>, vector<1x128xf32>
    %5 = vector.broadcast %4 : vector<1x128xf32> to vector<32x128xf32>
    %6 = arith.addf %3, %5 : vector<32x128xf32>
    %7 = arith.truncf %6 : vector<32x128xf32> to vector<32x128xbf16>
    %8 = arith.negf %7 : vector<32x128xbf16>
    %9 = math.exp %8 : vector<32x128xbf16>
    %cst_6 = arith.constant 1.000000e+00 : bf16
    %10 = vector.broadcast %cst_6 : bf16 to vector<32x128xbf16>
    %11 = arith.addf %10, %9 : vector<32x128xbf16>
    %12 = arith.divf %10, %11 : vector<32x128xbf16>
    %13 = arith.mulf %7, %12 : vector<32x128xbf16>
    %c0_7 = arith.constant 0 : index
    %c0_8 = arith.constant 0 : index
    %c0_9 = arith.constant 0 : index
    %14 = vector.load %arg6[%c0_7, %c0_8, %c0_9] : memref<1x32x128xbf16, #tpu.memory_space<vmem>>, vector<1x32x128xbf16>
    %15 = vector.shape_cast %14 : vector<1x32x128xbf16> to vector<32x128xbf16>
    %16 = vector.shape_cast %13 : vector<32x128xbf16> to vector<1x32x128xbf16>
    tpu.vector_store %arg6[%c0_7, %c0_8, %c0_9], %16 {strides = array<i32>} : memref<1x32x128xbf16, #tpu.memory_space<vmem>>, vector<1x32x128xbf16>,
    return
  }
  func.func @transform_0(%arg0: i32, %arg1: i32, %arg2: i32) -> (i32, i32, i32) {
    %c0_i32 = arith.constant 0 : i32
    %c0_i32_0 = arith.constant 0 : i32
    return %arg0, %arg1, %c0_i32 : i32, i32, i32
  }
  func.func @transform_1(%arg0: i32, %arg1: i32, %arg2: i32) -> (i32, i32) {
    %c0_i32 = arith.constant 0 : i32
    %c0_i32_0 = arith.constant 0 : i32
    return %c0_i32, %arg2 : i32, i32
  }
  func.func @transform_2(%arg0: i32, %arg1: i32, %arg2: i32) -> (i32, i32) {
    %c0_i32 = arith.constant 0 : i32
    %c0_i32_0 = arith.constant 0 : i32
    return %c0_i32, %arg2 : i32, i32
  }
  func.func @transform_3(%arg0: i32, %arg1: i32, %arg2: i32) -> (i32, i32, i32) {
    %c0_i32 = arith.constant 0 : i32
    return %arg0, %arg1, %arg2 : i32, i32, i32
  }
}

</mosaic_0001>

<bundles_post_ra>
// kernel: tpu_custom_call.1
= control target key start
LH: loop header
LB: loop body
LE: loop exit
PB: predicated region body
PF: predicated region fallthrough
CT: control target
= control target key end

     0   :  { %6 = vsyncpa [#allocation3], 0  ;;  %s286_s0 = inlined_call_operand.hbm [shape: f32[8,128], index: 0, kind: input, shape index: {}]   ;;  %s287_s1 = inlined_call_operand.hbm [shape: f32[8,128], index: 1, kind: output, shape index: {}]  }
   0x1   :  { %7 = vsyncpa [#allocation4], 0  ;;  %s269_s6 = smov 0  }
   0x2 LB: > { %s148_s7 = sadd.s32 4294967295, %s255_s6   ;;  %p149_p0 = scmp.ge.s32.totalorder %s255_s6, 1  ;;  %s255_s6 = sphi %s269_s6, %s13_s6  }
   0x3   : > { %p60_p1 = scmp.lt.s32.totalorder %s255_s6, 3  ;;  %s72_s10 = sshll.u32 %s286_s0, 4  ;;  %s73_s10 = int_to_ptr.hbm [resolvable:$true] %s72_s10 }
   0x4   : > { %p169_p3 = scmp.eq.s32.totalorder %s148_s7, 0  ;;  %s257_s11 = smov [#allocation2]  }
   0x5   : > { %p61_p2 = pnand %p149_p0, %p60_p1  ;;  %s74_s12 = sshll.u32 %s257_s11, 4  ;;  %s75_s12 = int_to_ptr.vmem [resolvable:$true] %s74_s12 }
   0x7   : > { %p165_p4 = pneg %p61_p2  ;;  %87 = sbr.rel (%p61_p2) target bundleno = 19 (0x13), region = 24 }
   0x9   : > { %p166_p5 = pnand %p169_p3, %p165_p4 }
   0xb   : > { %168 = dma.hbm_to_vmem [thread:$0]  (!%p166_p5), %s73_s10, 128, %s75_s12, [#allocation3]  }
   0xc   : > { %246 = dma.done.wait (%p169_p3), [#allocation3], 128  }
   0xd   : > { %248 = vsyncadd (%p169_p3), [#allocation3], 4294967168  ;;  %s258_s13 = smov [#allocation5]   ;;  %s108_s17 = sshll.u32 %s287_s1, 4  ;;  %v98_v0 = vld [vmem:[#allocation2] sm:$0xff]  ;;  %s109_s17 = int_to_ptr.hbm [resolvable:$true] %s108_s17 }
   0xe   : > { %s106_s14 = sshll.u32 %s258_s13, 4  ;;  %p171_p6 = scmp.eq.s32.totalorder %s148_s7, 1  ;;  %99 = vst [vmem:[#allocation5] sm:$0xff] %v98_v0  ;;  %s107_s14 = int_to_ptr.vmem [resolvable:$true] %s106_s14 }
  0x10   : > { %162 = dma.vmem_to_hbm [thread:$0]  (%p171_p6), %s107_s14, 128, %s109_s17, [#allocation4]  }
  0x11   : > { %250 = dma.done.wait (%p171_p6), [#allocation4], 128  }
  0x12   : > { %252 = vsyncadd (%p171_p6), [#allocation4], 4294967168 }
  0x13 PF: > { %s13_s6 = sadd.s32 1, %s255_s6  }
  0x14   : > { %p10_p7 = scmp.ge.s32.totalorder %s13_s6, 4  }
  0x16   :  { %12 = sbr.rel (!%p10_p7) target bundleno = 2 (0x2), region = 53 }
  0x1b   :  { %122 = vsyncpa [#allocation3], 1 }
  0x1c   :  { %124 = vsyncpa [#allocation3 + $0x1], 1 }
  0x1d   :  { %125 = vsyncpa [#allocation4], 1 }
  0x1e   :  { %127 = vsyncpa [#allocation4 + $0x1], 1 }

// kernel: conv_forward.1
= control target key start
LH: loop header
LB: loop body
LE: loop exit
PB: predicated region body
PF: predicated region fallthrough
CT: control target
= control target key end

     0   :  { %s720_s12 = smov 0   ;;  %s722_s13 = smov 0   ;;  %s806_s0 = inlined_call_operand.vmem [shape: bf16[2,64,36], index: 0, kind: input, shape index: {}]   ;;  %s807_s1 = inlined_call_operand.vmem [shape: bf16[36,128], index: 1, kind: input, shape index: {}]   ;;  %s808_s2 = inlined_call_operand.vmem [shape: f32[1,128], index: 2, kind: input, shape index: {}]   ;;  %s809_s3 = inlined_call_operand.vmem [shape: bf16[2,64,128], index: 3, kind: output, shape index: {}]  }
   0x1   :  { %s724_s14 = smov 0   ;;  %s726_s15 = smov 0  }
   0x2   :  { %s728_s16 = smov 0  }
   0x3 LB: > { %s28_s17 = sadd.s32 1, %s689_s14  ;;  %s32_s18 = sadd.s32 1, %s693_s15  ;;  %s697_s16 = sphi %s728_s16, %s13_s16   ;;  %s693_s15 = sphi %s726_s15, %s813_s15   ;;  %s689_s14 = sphi %s724_s14, %s812_s14   ;;  %s685_s13 = sphi %s722_s13, %s811_s13   ;;  %s681_s12 = sphi %s720_s12, %s810_s12  }
   0x4   : > { %p30_p0 = scmp.ge.s32.totalorder %s28_s17, 2  ;;  %p548_p1 = scmp.ge.s32.totalorder %s697_s16, 1 }
   0x5   : > { %p184_p2 = scmp.lt.s32.totalorder %s697_s16, 5 }
   0x6   : > { %s815_s17 = smov (%p30_p0, %s28_s17), 0  ;;  %s817_s18 = smov (!%p30_p0, %s32_s18), %s693_s15 }
   0x7   : > { %p185_p3 = pnand %p548_p1, %p184_p2  ;;  %p34_p4 = scmp.ge.s32.totalorder %s817_s18, 2 }
   0x8   : > { %s549_s21 = sshll.u32 (!%p185_p3), %s681_s12, 2  ;;  %p227_p5 = scmp.lt.s32.totalorder (!%p185_p3), %s685_s13, 1 }
   0x9   : > { %s819_s18 = smov (%p34_p4, %s817_s18), 0  ;;  %188 = sbr.rel (%p185_p3) target bundleno = 213 (0xd5), region = 32 }
   0xa   : > { %p229_p6 = scmp.lt.s32.totalorder (!%p185_p3), %s549_s21, 7 }
   0xe   : > { %v266_v0 = vld [vmem:[%s807_s1 + $0x10] sm:$0x3]  ;;  %vm303_vm0 = vcmask 1041408   ;;  %s821_s13 = smov (!%p227_p5, %s685_s13), 1  ;;  %s823_s21 = smov (!%p229_p6, %s549_s21), 7  ;;  %v578_v4 = vld [vmem:[%s807_s1 + $0x8] sm:$0xff] }
   0xf   : > { %v290_v1 = vunpack.c.l.b16 %v266_v0  ;;  %s550_s22 = sshll.u32 %s821_s13, 3  ;;  %v577_v5 = vld [vmem:[%s807_s1] sm:$0xff]  ;;  %vm296_vm1 = vcmask 293888   ;;  %v699_v58 = vmov 1065369472  }
  0x10   : > { %s756_s25 = sadd.s32 %s550_s22, %s823_s21  ;;  %v634_v8 = vld [vmem:[%s808_s2] ss:$0 sm:$0xff]  ;;  %v362_v59 = vunpack.c.h.bf16 %v699_v58  ;;  %v363_v60 = vunpack.c.l.bf16 %v699_v58 }
  0x11   : > { %v293_v2 = vpack.c.b16 %v290_v1, %v290_v1  ;;  %s551_s26 = sshll.u32 %s756_s25, 2 }
  0x12   : > { %s234_s4 = scalar_lea.vmem %s806_s0, %s551_s26  ;;  %s254_s9 = scalar_lea.vmem %s809_s3, %s551_s26 }
  0x13   : > { %v305_v3 = vsel %vm303_vm0, %v293_v2, 0  ;;  %v575_v6 = vld [vmem:[%s234_s4] sm:$0xff]  ;;  %v576_v7 = vld [vmem:[%s234_s4 + $0x8] sm:$0xff] }
  0x14   : > { %312 = vmatpush.bf16.msra.mxu0 %v305_v3  ;;  %590 = vmatpush.bf16.msra.mxu1 %v305_v3 }
  0x18   : > { %313 = vmatpush.bf16.msra.mxu0 %v578_v4  ;;  %591 = vmatpush.bf16.msra.mxu1 %v578_v4 }
  0x1c   : > { %314 = vmatpush.bf16.msra.mxu0 %v577_v5  ;;  %592 = vmatpush.bf16.msra.mxu1 %v577_v5 }
  0x1f   : > { %571 = vmatmul.msk.bf16.vlgmr.msra.gmra.mxu0 %vm296_vm1, %v575_v6  ;;  %572 = vmatmul.msk.bf16.vlgmr.msra.gmra.mxu1 %vm296_vm1, %v576_v7 }
  0x9c   : > { %v316_v9 = vpop.f32.mrf.mxu0  ;;  %v321_v10 = vpop.f32.mrf.mxu1 }
  0x9d   : > { %v317_v11 = vadd.f32 %v634_v8, %v316_v9  ;;  %v322_v12 = vadd.f32 %v634_v8, %v321_v10 }
  0x9f   : > { %v770_v13 = vpack.c.bf16 %v317_v11, %v317_v11  ;;  %v772_v14 = vpack.c.bf16 %v322_v12, %v322_v12 }
  0xa1   : > { %v330_v15 = vxor.u32 2147516416, %v770_v13  ;;  %v332_v16 = vxor.u32 2147516416, %v772_v14 }
  0xa3   : > { %v334_v17 = vunpack.c.l.bf16 %v330_v15  ;;  %v336_v18 = vunpack.c.l.bf16 %v332_v16 }
  0xa4   : > { %v318_v19 = vpop.f32.mrf.mxu0  ;;  %v323_v20 = vpop.f32.mrf.mxu1 }
  0xa5   : > { %v338_v21 = vmul.f32 1.442695, %v334_v17  ;;  %v342_v22 = vmul.f32 1.442695, %v336_v18  ;;  %v319_v23 = vadd.f32 %v634_v8, %v318_v19  ;;  %v324_v24 = vadd.f32 %v634_v8, %v323_v20 }
  0xa7   : > { %635 = vpow2.f32 %v338_v21  ;;  %v776_v25 = vpack.c.bf16 %v319_v23, %v319_v23  ;;  %v778_v26 = vpack.c.bf16 %v324_v24, %v324_v24 }
  0xa8   : > { %637 = vpow2.f32 %v342_v22  ;;  %v392_v22 = vunpack.c.l.bf16 %v770_v13 }
  0xa9   : > { %v331_v27 = vxor.u32 2147516416, %v776_v25  ;;  %v333_v28 = vxor.u32 2147516416, %v778_v26  ;;  %v393_v24 = vunpack.c.l.bf16 %v776_v25 }
  0xab   : > { %v335_v29 = vunpack.c.l.bf16 %v331_v27  ;;  %v337_v30 = vunpack.c.l.bf16 %v333_v28 }
  0xad   : > { %v636_v31 = vpop.eup %635  ;;  %v340_v32 = vmul.f32 1.442695, %v335_v29  ;;  %v344_v33 = vmul.f32 1.442695, %v337_v30  ;;  %v394_v29 = vunpack.c.l.bf16 %v772_v14 }
  0xae   : > { %v638_v34 = vpop.eup %637  ;;  %v346_v35 = vpack.c.bf16 %v636_v31, %v636_v31 }
  0xaf   : > { %v348_v36 = vpack.c.bf16 %v638_v34, %v638_v34  ;;  %639 = vpow2.f32 %v340_v32  ;;  %v395_v32 = vunpack.c.l.bf16 %v778_v26 }
  0xb0   : > { %v350_v37 = vunpack.c.l.bf16 %v346_v35  ;;  %641 = vpow2.f32 %v344_v33 }
  0xb1   : > { %v352_v38 = vunpack.c.l.bf16 %v348_v36 }
  0xb2   : > { %v354_v39 = vadd.f32 1.0, %v350_v37 }
  0xb3   : > { %v356_v40 = vadd.f32 1.0, %v352_v38 }
  0xb4   : > { %v358_v41 = vpack.c.bf16 %v354_v39, %v354_v39 }
  0xb5   : > { %v640_v42 = vpop.eup %639  ;;  %v360_v43 = vpack.c.bf16 %v356_v40, %v356_v40 }
  0xb6   : > { %v642_v44 = vpop.eup %641  ;;  %v364_v45 = vunpack.c.h.bf16 %v358_v41  ;;  %v365_v46 = vunpack.c.l.bf16 %v358_v41  ;;  %v347_v47 = vpack.c.bf16 %v640_v42, %v640_v42 }
  0xb7   : > { %v378_v48 = vunpack.c.h.bf16 %v360_v43  ;;  %v379_v49 = vunpack.c.l.bf16 %v360_v43  ;;  %v349_v50 = vpack.c.bf16 %v642_v44, %v642_v44 }
  0xb8   : > { %643 = vrcp.f32 %v364_v45  ;;  %v351_v51 = vunpack.c.l.bf16 %v347_v47 }
  0xb9   : > { %645 = vrcp.f32 %v365_v46  ;;  %v353_v52 = vunpack.c.l.bf16 %v349_v50 }
  0xba   : > { %647 = vrcp.f32 %v378_v48  ;;  %v355_v53 = vadd.f32 1.0, %v351_v51 }
  0xbb   : > { %649 = vrcp.f32 %v379_v49  ;;  %v357_v54 = vadd.f32 1.0, %v353_v52 }
  0xbc   : > { %v359_v55 = vpack.c.bf16 %v355_v53, %v355_v53 }
  0xbd   : > { %v361_v56 = vpack.c.bf16 %v357_v54, %v357_v54 }
  0xbe   : > { %v644_v57 = vpop.eup %643  ;;  %v371_v61 = vunpack.c.h.bf16 %v359_v55  ;;  %v372_v62 = vunpack.c.l.bf16 %v359_v55 }
  0xbf   : > { %v646_v63 = vpop.eup %645  ;;  %v385_v0 = vunpack.c.h.bf16 %v361_v56  ;;  %v386_v1 = vunpack.c.l.bf16 %v361_v56  ;;  %v367_v4 = vmul.f32 %v644_v57, %v362_v59 }
  0xc0   : > { %v648_v2 = vpop.eup %647  ;;  %651 = vrcp.f32 %v371_v61  ;;  %v369_v5 = vmul.f32 %v646_v63, %v363_v60 }
  0xc1   : > { %v650_v3 = vpop.eup %649  ;;  %653 = vrcp.f32 %v372_v62  ;;  %v381_v6 = vmul.f32 %v648_v2, %v362_v59 }
  0xc2   : > { %655 = vrcp.f32 %v385_v0  ;;  %v383_v7 = vmul.f32 %v650_v3, %v363_v60  ;;  %v370_v9 = vpack.c.bf16 %v367_v4, %v369_v5 }
  0xc3   : > { %657 = vrcp.f32 %v386_v1 }
  0xc4   : > { %v384_v15 = vpack.c.bf16 %v381_v6, %v383_v7  ;;  %v396_v19 = vunpack.c.l.bf16 %v370_v9 }
  0xc6   : > { %v652_v8 = vpop.eup %651  ;;  %v398_v23 = vunpack.c.l.bf16 %v384_v15  ;;  %v400_v30 = vmul.f32 %v396_v19, %v392_v22 }
  0xc7   : > { %v654_v10 = vpop.eup %653  ;;  %v374_v11 = vmul.f32 %v652_v8, %v362_v59 }
  0xc8   : > { %v656_v12 = vpop.eup %655  ;;  %v376_v16 = vmul.f32 %v654_v10, %v363_v60  ;;  %v402_v34 = vmul.f32 %v398_v23, %v394_v29 }
  0xc9   : > { %v658_v17 = vpop.eup %657  ;;  %v388_v18 = vmul.f32 %v656_v12, %v362_v59 }
  0xca   : > { %v377_v20 = vpack.c.bf16 %v374_v11, %v376_v16  ;;  %v390_v21 = vmul.f32 %v658_v17, %v363_v60 }
  0xcc   : > { %v397_v27 = vunpack.c.l.bf16 %v377_v20  ;;  %v391_v28 = vpack.c.bf16 %v388_v18, %v390_v21 }
  0xce   : > { %v401_v31 = vmul.f32 %v397_v27, %v393_v24  ;;  %v399_v33 = vunpack.c.l.bf16 %v391_v28 }
  0xd0   : > { %v582_v35 = vpack.c.bf16 %v401_v31, %v400_v30  ;;  %v403_v13 = vmul.f32 %v399_v33, %v395_v32 }
  0xd2   : > { %583 = vst [vmem:[%s254_s9] sm:$0xff] %v582_v35   ;;  %v587_v36 = vpack.c.bf16 %v403_v13, %v402_v34 }
  0xd4   : > { %589 = vst [vmem:[%s254_s9 + $0x8] sm:$0xff] %v587_v36  }
  0xd5 PF: > { %s13_s16 = sadd.s32 1, %s697_s16   ;;  %s810_s12 = smov %s689_s14 }
  0xd6   : > { %p10_p7 = scmp.ge.s32.totalorder %s13_s16, 6   ;;  %s811_s13 = smov %s693_s15 }
  0xd7   : > { %s812_s14 = smov %s815_s17  ;;  %s813_s15 = smov %s819_s18 }
  0xd8   :  { %12 = sbr.rel (!%p10_p7) target bundleno = 3 (0x3), region = 68 }

</bundles_post_ra>
